<compile_context>
chip_gen: v7x
topology: tpu7x:2x2x1
jax: 0.10.0
libtpu: 0.0.40
codegen_flags: <defaults>
</compile_context>

<pallas_src>
import functools
import math

import jax
import jax.numpy as jnp
from jax.experimental import pallas as pl
from jax.experimental.pallas import tpu as pltpu

_LANE = 128
_MIB = 1024 * 1024


def _round_up(x, m):
    return ((x + m - 1) // m) * m


def _cdiv(a, b):
    return (a + b - 1) // b


@functools.lru_cache(maxsize=None)
def _tpu_limits():
    """(vmem_limit_bytes, multi_core) derived from the local chip's physical VMEM."""
    vmem_phys = 128 * _MIB
    try:
        info = pltpu.get_tpu_info()
        vmem_phys = int(getattr(info, "vmem_capacity_bytes", vmem_phys))
    except Exception:
        pass  # fall back to conservative v5e/v6e numbers
    vmem_limit = max(32 * _MIB, vmem_phys - 16 * _MIB)   # 112 MiB v5e/v6e, 48 MiB v7x
    multi_core = vmem_phys <= 64 * _MIB                  # v7x-class: 64 MiB/TC, 2 TCs/chip
    return vmem_limit, multi_core


def _pick_nb(n, bytes_per_batch, target_bytes, multi_core):
    """Largest divisor of n keeping the block under the byte budget.  The '>=2 grid
    steps' constraint (feed both TensorCores) is applied only on v7x-class chips."""
    best = 1
    for nb in range(1, n + 1):
        if n % nb:
            continue
        if nb * bytes_per_batch > target_bytes:
            continue
        if multi_core and n >= 2 and n // nb < 2:
            continue
        best = nb
    return best


def _pick_hw_tile(hw, c, itemsize, target_bytes):
    """HW tile for the two-pass streaming path: either the full extent (one tile, exempt
    from the 128 rule) or the largest lane-aligned tile under the byte budget."""
    max_tile = max(_LANE, (target_bytes // max(1, c * itemsize)) // _LANE * _LANE)
    if max_tile >= hw:
        return hw
    return max_tile


def _gate_from_sums(sums, w_ref, *, inv_hw, k):
    """sums: (NB, C, 1) f32 per-channel sums -> sigmoid(conv1d_channels(mean)), (NB, C, 1)."""
    nb, c, _ = sums.shape
    pad = (k - 1) // 2
    pooled = sums * inv_hw                                      # mean over true HW
    if pad > 0:
        z = jnp.zeros((nb, pad, 1), dtype=pooled.dtype)
        pooled = jnp.concatenate([z, pooled, z], axis=1)        # zero-padded channel axis
    y = jnp.zeros((nb, c, 1), dtype=jnp.float32)
    for j in range(k):                                          # k is small & static
        y = y + w_ref[j] * pooled[:, j:j + c, :]                # PyTorch Conv1d (cross-corr)
    return jax.nn.sigmoid(y)                                    # EUP transcendental


def _fused_kernel(w_ref, x_ref, o_ref, *, hw, k):
    # x_ref/o_ref: (NB, C, HW) full-extent HW blocks; w_ref: (K,) SMEM scalars.
    sums = jnp.sum(x_ref[...].astype(jnp.float32), axis=-1, keepdims=True)   # (NB, C, 1)
    gate = _gate_from_sums(sums, w_ref, inv_hw=1.0 / hw, k=k)
    o_ref[...] = x_ref[...] * gate.astype(o_ref.dtype)          # scale in x.dtype


def _reduce_gate_kernel(w_ref, x_ref, gate_ref, acc_ref, *, hw, tile_hw, ragged, k):
    # grid = (batch_blocks, hw_tiles); the HW-tile axis is the reduction ("arbitrary").
    t = pl.program_id(1)

    @pl.when(t == 0)
    def _():
        acc_ref[...] = jnp.zeros_like(acc_ref)

    xt = x_ref[...].astype(jnp.float32)
    if ragged:
        # Last tile extends past hw: those lanes contain undefined data -> zero them.
        lane = jax.lax.broadcasted_iota(jnp.int32, xt.shape, dimension=2)
        xt = jnp.where(t * tile_hw + lane < hw, xt, 0.0)
    acc_ref[...] += jnp.sum(xt, axis=-1, keepdims=True)

    @pl.when(t == pl.num_programs(1) - 1)
    def _():
        gate_ref[...] = _gate_from_sums(acc_ref[...], w_ref, inv_hw=1.0 / hw, k=k)


def _scale_kernel(gate_ref, x_ref, o_ref):
    # gate_ref: (NB, C, 1) resident; x_ref/o_ref: (NB, C, TILE_HW) streamed tiles.
    # Ragged last-tile output stores are masked by Pallas automatically.
    o_ref[...] = x_ref[...] * gate_ref[...].astype(o_ref.dtype)


def eca_block(x, conv_weight, *, force_two_pass=False, hw_tile=None):
    """x: (N, C, H, W); conv_weight: (K,) Conv1d(1,1,K,bias=False) weight.
    Matches ECA_block.forward.  `force_two_pass` / `hw_tile` are test/tuning hooks."""
    n, c, h, w = x.shape
    hw = h * w
    k = int(conv_weight.shape[0])
    itemsize = jnp.dtype(x.dtype).itemsize
    conv_weight = conv_weight.astype(jnp.float32)

    vmem_limit, multi_core = _tpu_limits()
    block_target = min(8 * _MIB, vmem_limit // 4)   # streamed-block budget (two-pass path)
    fused_max_block = vmem_limit // 5               # fused: in+out double-buffered ~= 4x block

    x2 = x.reshape(n, c, hw)
    hw128 = _round_up(hw, _LANE)                    # VMEM lane-padded footprint per row
    slab_vmem = c * hw128 * itemsize                # one batch's (C, HW) slab in VMEM

    use_fused = (slab_vmem <= fused_max_block) and not force_two_pass
    if use_fused:
        nb = _pick_nb(n, slab_vmem, fused_max_block, multi_core)
        if multi_core and (n // nb) < 2:
            # Only one parallel step would leave one v7x TensorCore idle; re-route to the
            # two-pass path if its HW grid offers >= 2 parallel steps.
            tile_guess = _pick_hw_tile(hw, c, itemsize, block_target)
            if _cdiv(hw, tile_guess) >= 2:
                use_fused = False

    if use_fused:
        # ---- single fused pass: whole (C, HW) slab per grid step (2x HBM traffic) ----
        out = pl.pallas_call(
            functools.partial(_fused_kernel, hw=hw, k=k),
            out_shape=jax.ShapeDtypeStruct((n, c, hw), x.dtype),
            grid=(n // nb,),
            in_specs=[
                pl.BlockSpec(memory_space=pltpu.MemorySpace.SMEM),      # conv weight (K,)
                pl.BlockSpec((nb, c, hw), lambda i: (i, 0, 0)),         # full-extent HW block
            ],
            out_specs=pl.BlockSpec((nb, c, hw), lambda i: (i, 0, 0)),
            compiler_params=pltpu.CompilerParams(
                dimension_semantics=("parallel",),
                vmem_limit_bytes=vmem_limit),
        )(conv_weight, x2)
    else:
        # ---- two-pass, HW-tiled (bounded VMEM for big slabs); 3x HBM traffic ----
        tile_hw = hw_tile if hw_tile is not None else _pick_hw_tile(hw, c, itemsize, block_target)
        num_tiles = _cdiv(hw, tile_hw)
        ragged = (hw % tile_hw) != 0
        nb = _pick_nb(n, c * _round_up(tile_hw, _LANE) * itemsize, block_target, multi_core)

        # pass 1: per-channel sums (masked ragged tail) -> conv across channels -> sigmoid
        gate = pl.pallas_call(
            functools.partial(_reduce_gate_kernel, hw=hw, tile_hw=tile_hw, ragged=ragged, k=k),
            out_shape=jax.ShapeDtypeStruct((n, c, 1), jnp.float32),
            grid=(n // nb, num_tiles),
            in_specs=[
                pl.BlockSpec(memory_space=pltpu.MemorySpace.SMEM),
                pl.BlockSpec((nb, c, tile_hw), lambda i, j: (i, 0, j)),
            ],
            out_specs=pl.BlockSpec((nb, c, 1), lambda i, j: (i, 0, 0)),
            scratch_shapes=[pltpu.VMEM((nb, c, 1), jnp.float32)],
            compiler_params=pltpu.CompilerParams(
                dimension_semantics=("parallel", "arbitrary"),
                vmem_limit_bytes=vmem_limit),
        )(conv_weight, x2)

        # pass 2: stream x tiles and scale by the resident gate (ragged stores auto-masked)
        out = pl.pallas_call(
            _scale_kernel,
            out_shape=jax.ShapeDtypeStruct((n, c, hw), x.dtype),
            grid=(n // nb, num_tiles),
            in_specs=[
                pl.BlockSpec((nb, c, 1), lambda i, j: (i, 0, 0)),
                pl.BlockSpec((nb, c, tile_hw), lambda i, j: (i, 0, j)),
            ],
            out_specs=pl.BlockSpec((nb, c, tile_hw), lambda i, j: (i, 0, j)),
            compiler_params=pltpu.CompilerParams(
                dimension_semantics=("parallel", "parallel"),
                vmem_limit_bytes=vmem_limit),
        )(gate, x2)

    return out.reshape(n, c, h, w)


def eca_reference(x, conv_weight):
    """Pure-JAX reference matching the PyTorch forward."""
    n, c, h, w = x.shape
    k = conv_weight.shape[0]
    pad = (k - 1) // 2
    pooled = jnp.mean(x.astype(jnp.float32), axis=(2, 3))          # (N, C)
    padded = jnp.pad(pooled, ((0, 0), (pad, pad)))
    y = jnp.zeros_like(pooled)
    for j in range(k):
        y = y + conv_weight[j] * padded[:, j:j + c]
    gate = jax.nn.sigmoid(y)[:, :, None, None]
    return (x * gate).astype(x.dtype)


if __name__ == "__main__":
    # ECA hyper-params: channel=16, b=1, gamma=2 -> kernel_size 3, padding 1
    channel, b_, gamma = 16, 1, 2
    ksize = int(abs((math.log(channel, 2) + b_) / gamma))
    ksize = ksize if ksize % 2 else ksize + 1

    key = jax.random.PRNGKey(0)
    kx, kw, kx2, kx3 = jax.random.split(key, 4)
    n, c, h, w = 2, channel, 16, 16
    x = jax.random.normal(kx, (n, c, h, w), dtype=jnp.float32)
    conv_weight = jax.random.normal(kw, (ksize,), dtype=jnp.float32) * 0.5
    ref = eca_reference(x, conv_weight)

    # 1) default (fused whole-slab) path
    out = jax.block_until_ready(eca_block(x, conv_weight))
    assert out.shape == (n, c, h, w)
    assert jnp.allclose(out, ref, atol=1e-5, rtol=1e-5), "fused path mismatch"

    # 2) two-pass HW-tiled path (the large-slab structure)
    out2 = jax.block_until_ready(eca_block(x, conv_weight, force_two_pass=True))
    assert jnp.allclose(out2, ref, atol=1e-5, rtol=1e-5), "two-pass path mismatch"

    # 3) non-multiple-of-128 spatial size -> full-extent (no wrapper pad/slice) fused block
    x3 = jax.random.normal(kx2, (2, channel, 9, 9), dtype=jnp.float32)
    out3 = jax.block_until_ready(eca_block(x3, conv_weight))
    assert jnp.allclose(out3, eca_reference(x3, conv_weight), atol=1e-5, rtol=1e-5), \
        "full-extent (no-pad) path mismatch"

    # 4) ragged HW tiling in the two-pass path: masked reduce + auto-masked ragged stores
    x4 = jax.random.normal(kx3, (2, channel, 20, 20), dtype=jnp.float32)   # hw=400, tile=128
    out4 = jax.block_until_ready(
        eca_block(x4, conv_weight, force_two_pass=True, hw_tile=128))
    assert jnp.allclose(out4, eca_reference(x4, conv_weight), atol=1e-5, rtol=1e-5), \
        "ragged two-pass path mismatch"

    print("KERNEL_OK")
</pallas_src>

<mosaic_0001>
module attributes {stable_mosaic.version = 11 : i64} {
  func.func @_fused_kernel(%arg0: i32, %arg1: memref<3xf32, #tpu.memory_space<smem>>, %arg2: memref<2x16x256xf32, #tpu.memory_space<vmem>>, %arg3: memref<2x16x256xf32, #tpu.memory_space<vmem>>) attributes {dimension_semantics = [#tpu.dimension_semantics<parallel>], iteration_bounds = array<i64: 1>, scalar_prefetch = 0 : i64, scratch_operands = 0 : i64, tpu.core_type = #tpu.core_type<tc>, window_params = [{transform_indices = @transform_0, window_bounds = array<i64: 3>}, {transform_indices = @transform_1, window_bounds = array<i64: 2, 16, 256>}, {transform_indices = @transform_2, window_bounds = array<i64: 2, 16, 256>}]} {
    %c0 = arith.constant 0 : index
    %c0_0 = arith.constant 0 : index
    %c0_1 = arith.constant 0 : index
    %0 = vector.load %arg2[%c0, %c0_0, %c0_1] : memref<2x16x256xf32, #tpu.memory_space<vmem>>, vector<2x16x256xf32>
    %cst = arith.constant dense<0.000000e+00> : vector<2x16xf32>
    %1 = vector.multi_reduction <add>, %0, %cst [2] : vector<2x16x256xf32> to vector<2x16xf32>
    %2 = vector.shape_cast %1 : vector<2x16xf32> to vector<2x16x1xf32>
    %cst_2 = arith.constant 3.906250e-03 : f32
    %3 = vector.broadcast %cst_2 : f32 to vector<2x16x1xf32>
    %4 = arith.mulf %2, %3 : vector<2x16x1xf32>
    %cst_3 = arith.constant 0.000000e+00 : f32
    %5 = vector.broadcast %cst_3 : f32 to vector<2x1x1xf32>
    %6 = tpu.concatenate %5, %4, %5 in 1 : vector<2x1x1xf32>, vector<2x16x1xf32>, vector<2x1x1xf32> -> vector<2x18x1xf32>
    %cst_4 = arith.constant 0.000000e+00 : f32
    %7 = vector.broadcast %cst_4 : f32 to vector<2x16x1xf32>
    %c0_5 = arith.constant 0 : index
    %8 = memref.load %arg1[%c0_5] : memref<3xf32, #tpu.memory_space<smem>>
    %9 = vector.extract_strided_slice %6 {offsets = [0, 0, 0], sizes = [2, 16, 1], strides = [1, 1, 1]} : vector<2x18x1xf32> to vector<2x16x1xf32>
    %10 = vector.broadcast %8 : f32 to vector<2x16x1xf32>
    %11 = arith.mulf %10, %9 : vector<2x16x1xf32>
    %12 = arith.addf %7, %11 : vector<2x16x1xf32>
    %c1 = arith.constant 1 : index
    %13 = memref.load %arg1[%c1] : memref<3xf32, #tpu.memory_space<smem>>
    %14 = vector.extract_strided_slice %6 {offsets = [0, 1, 0], sizes = [2, 16, 1], strides = [1, 1, 1]} : vector<2x18x1xf32> to vector<2x16x1xf32>
    %15 = vector.broadcast %13 : f32 to vector<2x16x1xf32>
    %16 = arith.mulf %15, %14 : vector<2x16x1xf32>
    %17 = arith.addf %12, %16 : vector<2x16x1xf32>
    %c2 = arith.constant 2 : index
    %18 = memref.load %arg1[%c2] : memref<3xf32, #tpu.memory_space<smem>>
    %19 = vector.extract_strided_slice %6 {offsets = [0, 2, 0], sizes = [2, 16, 1], strides = [1, 1, 1]} : vector<2x18x1xf32> to vector<2x16x1xf32>
    %20 = vector.broadcast %18 : f32 to vector<2x16x1xf32>
    %21 = arith.mulf %20, %19 : vector<2x16x1xf32>
    %22 = arith.addf %17, %21 : vector<2x16x1xf32>
    %23 = arith.negf %22 : vector<2x16x1xf32>
    %24 = math.exp %23 : vector<2x16x1xf32>
    %cst_6 = arith.constant 1.000000e+00 : f32
    %25 = vector.broadcast %cst_6 : f32 to vector<2x16x1xf32>
    %26 = arith.addf %25, %24 : vector<2x16x1xf32>
    %27 = arith.divf %25, %26 : vector<2x16x1xf32>
    %c0_7 = arith.constant 0 : index
    %c0_8 = arith.constant 0 : index
    %c0_9 = arith.constant 0 : index
    %28 = vector.load %arg2[%c0_7, %c0_8, %c0_9] : memref<2x16x256xf32, #tpu.memory_space<vmem>>, vector<2x16x256xf32>
    %29 = vector.broadcast %27 : vector<2x16x1xf32> to vector<2x16x256xf32>
    %30 = arith.mulf %28, %29 : vector<2x16x256xf32>
    %c0_10 = arith.constant 0 : index
    %c0_11 = arith.constant 0 : index
    %c0_12 = arith.constant 0 : index
    %31 = vector.load %arg3[%c0_10, %c0_11, %c0_12] : memref<2x16x256xf32, #tpu.memory_space<vmem>>, vector<2x16x256xf32>
    tpu.vector_store %arg3[%c0_10, %c0_11, %c0_12], %30 {strides = array<i32>} : memref<2x16x256xf32, #tpu.memory_space<vmem>>, vector<2x16x256xf32>,
    return
  }
  func.func @transform_0(%arg0: i32) -> i32 {
    %c0_i32 = arith.constant 0 : i32
    %c0_i32_0 = arith.constant 0 : i32
    return %c0_i32 : i32
  }
  func.func @transform_1(%arg0: i32) -> (i32, i32, i32) {
    %c0_i32 = arith.constant 0 : i32
    %c0_i32_0 = arith.constant 0 : i32
    %c0_i32_1 = arith.constant 0 : i32
    return %arg0, %c0_i32, %c0_i32_0 : i32, i32, i32
  }
  func.func @transform_2(%arg0: i32) -> (i32, i32, i32) {
    %c0_i32 = arith.constant 0 : i32
    %c0_i32_0 = arith.constant 0 : i32
    %c0_i32_1 = arith.constant 0 : i32
    return %arg0, %c0_i32, %c0_i32_0 : i32, i32, i32
  }
}

</mosaic_0001>

<bundles_post_ra>
// kernel: tpu_custom_call.1
= control target key start
LH: loop header
LB: loop body
LE: loop exit
PB: predicated region body
PF: predicated region fallthrough
CT: control target
= control target key end

     0   :  { %7 = vsyncpa [#allocation5], 0  ;;  %s435_s0 = inlined_call_operand.hbm [shape: f32[3], index: 0, kind: input, shape index: {}]   ;;  %s436_s1 = inlined_call_operand.hbm [shape: f32[2,16,256], index: 1, kind: input, shape index: {}]   ;;  %s437_s2 = inlined_call_operand.hbm [shape: f32[2,16,256], index: 2, kind: output, shape index: {}]  }
   0x1   :  { %8 = vsyncpa [#allocation3], 0 }
   0x2   :  { %9 = vsyncpa [#allocation4], 0  ;;  %s266_s11 = scalar_lea.hbm %s435_s0, 16 }
   0x3   :  { %p267_p0 = scmp.ne.s32.totalorder %s435_s0, %s266_s11  ;;  %p270_p1 = scmp.lt.u32.totalorder %s266_s11, %s435_s0 }
   0x5   :  { %p272_p2 = pnand %p270_p1, %p267_p0 }
   0x7   :  { %275 = shalt.err (!%p272_p2)
}
   0x8   :  { %s326_s16 = smov [#allocation2]   ;;  %s327_s19 = smov [#allocation6]  }
   0x9   :  { %17 = dma.hbm_to_smem %s435_s0, 16, %s326_s16, [#allocation5]  }
   0xa   :  { %s23_s20 = sshll.u32 %s327_s19, 4  ;;  %s276_s23 = scalar_lea.hbm %s436_s1, 1024  ;;  %s24_s20 = int_to_ptr.vmem [resolvable:$true] %s23_s20 }
   0xb   :  { %p277_p3 = scmp.ne.s32.totalorder %s436_s1, %s276_s23  ;;  %p280_p4 = scmp.lt.u32.totalorder %s276_s23, %s436_s1 }
   0xd   :  { %p282_p5 = pnand %p280_p4, %p277_p3 }
   0xf   :  { %285 = shalt.err (!%p282_p5)
}
  0x10   :  { %s286_s28 = scalar_lea.vmem %s24_s20, 1024  ;;  %p291_p7 = scmp.lt.s32.totalorder %s24_s20, %s24_s20 }
  0x11   :  { %p287_p6 = scmp.ne.s32.totalorder %s24_s20, %s286_s28  ;;  %p292_p8 = scmp.lt.s32.totalorder %s286_s28, %s286_s28 }
  0x13   :  { %p293_p9 = por %p292_p8, %p291_p7 }
  0x15   :  { %p294_p10 = pnand %p293_p9, %p287_p6 }
  0x17   :  { %297 = shalt.err (!%p294_p10)
}
  0x18   :  { %s328_s0 = smov 256   ;;  %s329_s29 = smov 16  }
  0x19   :  { %29 = dma.hbm_to_vmem [thread:$0]  %s436_s1, 1024, %s24_s20, [#allocation3], %s328_s0, %s328_s0, %s329_s29  }
  0x1a   :  { %320 = dma.done.wait [#allocation5], 16  }
  0x1b   :  { %321 = vsyncadd [#allocation5], 4294967280 }
  0x1c   :  { %322 = dma.done.wait [#allocation3], 1024  }
  0x1d   :  { %323 = vsyncadd [#allocation3], 4294966272 }
  0x1e   :  { %36 = sfence }
  0x1f   :  { %v374_v0 = vld [vmem:[#allocation6 + $0x20] sm:$0xff]  ;;  %v376_v1 = vld [vmem:[#allocation6 + $0x28] sm:$0xff]  ;;  %v384_v5 = vld [vmem:[#allocation6 + $0x30] sm:$0xff]  ;;  %v330_v12 = vmov 0   ;;  %s236_s1 = sld [smem:[#allocation2 + $0x1]]  ;;  %s237_s4 = sld [smem:[#allocation2 + $0x2]] }
  0x20   :  { %v378_v2 = vld [vmem:[#allocation6] sm:$0xff]  ;;  %v51_v3 = vadd.f32 %v376_v1, %v374_v0  ;;  %v382_v4 = vld [vmem:[#allocation6 + $0x8] sm:$0xff]  ;;  %v386_v6 = vld [vmem:[#allocation6 + $0x38] sm:$0xff]  ;;  %249 = vset.pattern.permute.xlu1 %v330_v12  ;;  %248 = vset.pattern.permute.xlu0 %v330_v12  ;;  %s82_s5 = sld [smem:[#allocation2]]  ;;  %vm65_vm0 = vcmask 1040384   ;;  %vm106_vm1 = vcmask 1046528  }
  0x21   :  { %v45_v7 = vadd.f32 %v382_v4, %v378_v2  ;;  %v390_v8 = vld [vmem:[#allocation6 + $0x10] sm:$0xff]  ;;  %v392_v9 = vld [vmem:[#allocation6 + $0x18] sm:$0xff]  ;;  %v54_v10 = vadd.f32 %v386_v6, %v384_v5  ;;  %vm139_vm2 = vcmask 1045504   ;;  %s331_s6 = smov [#allocation7]  }
  0x22   :  { %52 = vadd.xlane.f32.xlu1 %v51_v3  ;;  %v48_v11 = vadd.f32 %v392_v9, %v390_v8  ;;  %s223_s7 = sshll.u32 %s331_s6, 4  ;;  %s224_s7 = int_to_ptr.vmem [resolvable:$true] %s223_s7 }
  0x23   :  { %46 = vadd.xlane.f32.xlu0 %v45_v7  ;;  %s298_s8 = scalar_lea.vmem %s224_s7, 1024  ;;  %p303_p12 = scmp.lt.s32.totalorder %s224_s7, %s224_s7 }
  0x24   :  { %p299_p11 = scmp.ne.s32.totalorder %s224_s7, %s298_s8  ;;  %p304_p13 = scmp.lt.s32.totalorder %s298_s8, %s298_s8 }
  0x25   :  { %v93_v19 = vstv %s236_s1  ;;  %v126_v25 = vstv %s237_s4 }
  0x26   :  { %55 = vadd.xlane.f32.xlu1 %v54_v10  ;;  %v83_v36 = vstv %s82_s5  ;;  %p305_p0 = por %p304_p13, %p303_p12 }
  0x27   :  { %49 = vadd.xlane.f32.xlu0 %v48_v11 }
  0x28   :  { %p306_p1 = pnand %p305_p0, %p299_p11 }
  0xaf   :  { %v53_v13 = vpop.xlane.xlu1 %52 }
  0xb0   :  { %v59_v14 = vmul.f32 0.00390625, %v53_v13  ;;  %v47_v15 = vpop.xlane.xlu0 %46 }
  0xb1   :  { %v57_v16 = vmul.f32 0.00390625, %v47_v15 }
  0xb2   :  { %v69_v17 = vrot.slane %v59_v14, 7 }
  0xb3   :  { %v56_v18 = vpop.xlane.xlu1 %55  ;;  %v66_v21 = vrot.slane %v57_v16, 7 }
  0xb4   :  { %v79_v20 = vsel %vm65_vm0, 0.0, %v69_v17  ;;  %v60_v22 = vmul.f32 0.00390625, %v56_v18  ;;  %v50_v23 = vpop.xlane.xlu0 %49 }
  0xb5   :  { %v97_v24 = vmul.f32 %v93_v19, %v79_v20  ;;  %v130_v27 = vmul.f32 %v126_v25, %v79_v20  ;;  %v58_v28 = vmul.f32 0.00390625, %v50_v23  ;;  %v78_v29 = vsel %vm65_vm0, 0.0, %v66_v21 }
  0xb6   :  { %v70_v26 = vrot.slane %v60_v22, 7  ;;  %v86_v42 = vmul.f32 %v83_v36, %v79_v20  ;;  %v94_v43 = vmul.f32 %v93_v19, %v78_v29  ;;  %v84_v46 = vmul.f32 %v83_v36, %v78_v29 }
  0xb7   :  { %v112_v32 = vrot.slane %v97_v24, 1  ;;  %v67_v37 = vrot.slane %v58_v28, 7  ;;  %v145_v38 = vrot.slane %v130_v27, 2  ;;  %v127_v49 = vmul.f32 %v126_v25, %v78_v29 }
  0xb8   :  { %v71_v30 = vsel %vm65_vm0, %v69_v17, %v70_v26  ;;  %v81_v31 = vsel %vm65_vm0, %v70_v26, 0.0  ;;  %v107_v57 = vrot.slane %v94_v43, 1 }
  0xb9   :  { %v98_v33 = vmul.f32 %v93_v19, %v71_v30  ;;  %v99_v34 = vmul.f32 %v93_v19, %v81_v31  ;;  %v131_v35 = vmul.f32 %v126_v25, %v71_v30  ;;  %v68_v44 = vsel %vm65_vm0, %v66_v21, %v67_v37 }
  0xba   :  { %v80_v45 = vsel %vm65_vm0, %v67_v37, 0.0  ;;  %v132_v48 = vmul.f32 %v126_v25, %v81_v31  ;;  %v95_v52 = vmul.f32 %v93_v19, %v68_v44  ;;  %v128_v55 = vmul.f32 %v126_v25, %v68_v44 }
  0xbb   :  { %v113_v39 = vrot.slane %v98_v33, 1  ;;  %v115_v40 = vrot.slane %v99_v34, 1  ;;  %v146_v41 = vrot.slane %v131_v35, 2  ;;  %v96_v54 = vmul.f32 %v93_v19, %v80_v45 }
  0xbc   :  { %v129_v56 = vmul.f32 %v126_v25, %v80_v45  ;;  %v87_v58 = vmul.f32 %v83_v36, %v71_v30  ;;  %v108_v60 = vrot.slane %v95_v52, 1  ;;  %v148_v61 = vrot.slane %v132_v48, 2 }
  0xbd   :  { %v114_v47 = vsel %vm106_vm1, %v112_v32, %v113_v39  ;;  %v116_v50 = vsel %vm106_vm1, %v113_v39, %v115_v40  ;;  %v147_v53 = vsel %vm139_vm2, %v145_v38, %v146_v41  ;;  %v110_v62 = vrot.slane %v96_v54, 1 }
  0xbe   :  { %v123_v51 = vadd.f32 %v114_v47, %v86_v42  ;;  %v141_v63 = vrot.slane %v128_v55, 2  ;;  %v143_v3 = vrot.slane %v129_v56, 2  ;;  %v140_v7 = vrot.slane %v127_v49, 2 }
  0xbf   :  { %v124_v10 = vadd.f32 %v116_v50, %v87_v58  ;;  %v85_v11 = vmul.f32 %v83_v36, %v68_v44  ;;  %v109_v12 = vsel %vm106_vm1, %v107_v57, %v108_v60  ;;  %v111_v13 = vsel %vm106_vm1, %v108_v60, %v110_v62 }
  0xc0   :  { %v156_v59 = vadd.f32 %v147_v53, %v123_v51  ;;  %v121_v14 = vadd.f32 %v109_v12, %v84_v46  ;;  %v142_v17 = vsel %vm139_vm2, %v140_v7, %v141_v63  ;;  %v149_v18 = vsel %vm139_vm2, %v146_v41, %v148_v61 }
  0xc1   :  { %v122_v16 = vadd.f32 %v111_v13, %v85_v11  ;;  %v144_v19 = vsel %vm139_vm2, %v141_v63, %v143_v3  ;;  %v157_v21 = vadd.f32 %v149_v18, %v124_v10 }
  0xc2   :  { %v240_v15 = vmul.f32 -1.442695, %v156_v59  ;;  %v154_v20 = vadd.f32 %v142_v17, %v121_v14 }
  0xc3   :  { %v155_v22 = vadd.f32 %v144_v19, %v122_v16  ;;  %v241_v25 = vmul.f32 -1.442695, %v157_v21 }
  0xc4   :  { %v238_v23 = vmul.f32 -1.442695, %v154_v20  ;;  %250 = vpow2.f32 %v240_v15 }
  0xc5   :  { %v239_v24 = vmul.f32 -1.442695, %v155_v22 }
  0xc6   :  { %252 = vpow2.f32 %v238_v23 }
  0xc7   :  { %254 = vpow2.f32 %v239_v24 }
  0xc8   :  { %256 = vpow2.f32 %v241_v25 }
  0xce   :  { %v251_v26 = vpop.eup %250 }
  0xcf   :  { %v172_v31 = vadd.f32 1.0, %v251_v26 }
  0xd0   :  { %v253_v27 = vpop.eup %252 }
  0xd1   :  { %v255_v28 = vpop.eup %254  ;;  %v170_v29 = vadd.f32 1.0, %v253_v27 }
  0xd2   :  { %v171_v30 = vadd.f32 1.0, %v255_v28  ;;  %v257_v32 = vpop.eup %256 }
  0xd3   :  { %258 = vrcp.f32 %v170_v29  ;;  %v173_v33 = vadd.f32 1.0, %v257_v32 }
  0xd4   :  { %260 = vrcp.f32 %v171_v30 }
  0xd5   :  { %262 = vrcp.f32 %v172_v31 }
  0xd6   :  { %264 = vrcp.f32 %v173_v33 }
  0xdd   :  { %v259_v34 = vpop.eup %258 }
  0xde   :  { %v261_v35 = vpop.eup %260  ;;  %184 = vperm.xlu0 %248, %v259_v34  }
  0xdf   :  { %189 = vperm.xlu1 %249, %v261_v35   ;;  %v263_v36 = vpop.eup %262 }
  0xe0   :  { %v265_v37 = vpop.eup %264 }
  0xe3   :  { %194 = vperm.xlu1 %249, %v263_v36  }
  0xe7   :  { %199 = vperm.xlu1 %249, %v265_v37  }
 0x15d   :  { %v185_v38 = vpop.permute.xlu0 %184 }
 0x15e   :  { %v202_v39 = vmul.f32 %v185_v38, %v378_v2  ;;  %v203_v40 = vmul.f32 %v185_v38, %v382_v4  ;;  %v190_v41 = vpop.permute.xlu1 %189 }
 0x15f   :  { %v204_v42 = vmul.f32 %v190_v41, %v390_v8  ;;  %v205_v43 = vmul.f32 %v190_v41, %v392_v9 }
 0x160   :  { %210 = vst [vmem:[#allocation7] sm:$0xff] %v202_v39  ;;  %211 = vst [vmem:[#allocation7 + $0x8] sm:$0xff] %v203_v40 }
 0x161   :  { %212 = vst [vmem:[#allocation7 + $0x10] sm:$0xff] %v204_v42  ;;  %213 = vst [vmem:[#allocation7 + $0x18] sm:$0xff] %v205_v43 }
 0x162   :  { %v195_v44 = vpop.permute.xlu1 %194 }
 0x163   :  { %v206_v45 = vmul.f32 %v195_v44, %v374_v0  ;;  %v207_v46 = vmul.f32 %v195_v44, %v376_v1 }
 0x165   :  { %214 = vst [vmem:[#allocation7 + $0x20] sm:$0xff] %v206_v45  ;;  %215 = vst [vmem:[#allocation7 + $0x28] sm:$0xff] %v207_v46 }
 0x166   :  { %v200_v2 = vpop.permute.xlu1 %199 }
 0x167   :  { %v208_v4 = vmul.f32 %v200_v2, %v384_v5  ;;  %v209_v8 = vmul.f32 %v200_v2, %v386_v6 }
 0x169   :  { %216 = vst [vmem:[#allocation7 + $0x30] sm:$0xff] %v208_v4  ;;  %217 = vst [vmem:[#allocation7 + $0x38] sm:$0xff] %v209_v8 }
 0x16a   :  { %309 = shalt.err (!%p306_p1)
}
 0x16b   :  { %s310_s11 = scalar_lea.hbm %s437_s2, 1024 }
 0x16c   :  { %p311_p2 = scmp.ne.s32.totalorder %s437_s2, %s310_s11  ;;  %p314_p3 = scmp.lt.u32.totalorder %s310_s11, %s437_s2 }
 0x16e   :  { %p316_p4 = pnand %p314_p3, %p311_p2 }
 0x170   :  { %319 = shalt.err (!%p316_p4)
}
 0x171   :  { %229 = dma.vmem_to_hbm [thread:$0]  %s224_s7, 1024, %s437_s2, [#allocation4], %s328_s0, %s328_s0, %s329_s29  }
 0x172   :  { %324 = dma.done.wait [#allocation4], 1024  }
 0x173   :  { %325 = vsyncadd [#allocation4], 4294966272 }
 0x174   :  { %233 = vsyncpa [#allocation3], 1 }
 0x175   :  { %234 = vsyncpa [#allocation4], 1 }
 0x176   :  { %235 = vsyncpa [#allocation5], 1 }

</bundles_post_ra>
